<compile_context>
chip_gen: v6e
topology: v6e:2x2x1
jax: 0.10.0
libtpu: 0.0.40
codegen_flags: <defaults>
</compile_context>

<pallas_src>
import functools

import jax
import jax.numpy as jnp
from jax import lax
from jax.experimental import pallas as pl
from jax.experimental.pallas import tpu as pltpu

_VMEM_LIMIT_BYTES = 32 * 1024 * 1024


def _choose_layout(n_elems):
    """Pick (lane_width, block_rows): the biggest lane-dense block that keeps
    3 refs x 2 double-buffers well inside VMEM on all generations."""
    if n_elems >= (1 << 20):
        return 1024, 256        # 1 MiB / ref / block  (~85% of HBM roofline)
    if n_elems >= (1 << 17):
        return 512, 128         # 256 KiB
    if n_elems >= (1 << 14):
        return 256, 64          # 64 KiB
    if n_elems >= (1 << 11):
        return 256, 8
    return 128, 8


def _weighted_sq_err(logit, target, threshold):
    # In-kernel upcast (free on the VPU); keeps HBM traffic in the input dtype.
    t = target.astype(jnp.float32)
    l = logit.astype(jnp.float32)
    abs_t = jnp.maximum(jnp.abs(t), 1e-8)          # clamp(min=1e-8)
    sq = jnp.square(t - l)
    return jnp.where(abs_t < threshold, sq, sq / abs_t)


def _elementwise_kernel(logit_ref, target_ref, out_ref, *, threshold):
    loss = _weighted_sq_err(logit_ref[...], target_ref[...], threshold)
    out_ref[...] = loss.astype(out_ref.dtype)


def _reduce_partial_kernel(logit_ref, target_ref, out_ref, *, threshold,
                           valid_rows, block_rows):
    loss = _weighted_sq_err(logit_ref[...], target_ref[...], threshold)
    if valid_rows % block_rows:
        # Static check: only emitted when the grid is ragged.  Zero the
        # out-of-bounds rows of the (possibly garbage-filled) last block.
        row = (pl.program_id(0) * block_rows
               + lax.broadcasted_iota(jnp.int32, loss.shape, 0))
        loss = jnp.where(row < valid_rows, loss, 0.0)
    # Fold the (block_rows, width) block into an (8, width) per-lane partial:
    # sublane-aligned static slices -> pure VPU adds, no XLU, no scalar chain.
    partial = loss[:8, :]
    for r in range(8, loss.shape[0], 8):
        partial = partial + loss[r:r + 8, :]
    out_ref[...] = partial


def weighted_mse_loss(logit, target, *, threshold=0.001, reduction="none"):
    assert logit.shape == target.shape
    orig_shape = logit.shape
    n_elems = int(logit.size)
    out_dtype = jnp.promote_types(logit.dtype, target.dtype)

    width, block_rows = _choose_layout(n_elems)

    # Flatten (free reshape for contiguous inputs).  Pad only when the element
    # count is not a multiple of the lane width; padded zeros give zero loss
    # (target=0 -> abs=1e-8 < threshold -> (0-0)^2 = 0), so reductions stay exact.
    lf = logit.reshape(-1)
    tf = target.reshape(-1)
    n_pad = (-n_elems) % width
    if n_pad:
        # TODO(synk): handle the sub-width element tail fully in-kernel to avoid
        # this (small) padded copy of the inputs.
        lf = jnp.pad(lf, (0, n_pad))
        tf = jnp.pad(tf, (0, n_pad))
    rows = (n_elems + n_pad) // width
    lf = lf.reshape(rows, width)
    tf = tf.reshape(rows, width)

    n_blocks = pl.cdiv(rows, block_rows)
    grid = (n_blocks,)
    in_specs = [
        pl.BlockSpec((block_rows, width), lambda i: (i, 0)),
        pl.BlockSpec((block_rows, width), lambda i: (i, 0)),
    ]
    compiler_params = pltpu.CompilerParams(
        dimension_semantics=("parallel",),
        vmem_limit_bytes=_VMEM_LIMIT_BYTES,
    )

    if reduction == "none":
        out = pl.pallas_call(
            functools.partial(_elementwise_kernel, threshold=threshold),
            out_shape=jax.ShapeDtypeStruct((rows, width), out_dtype),
            grid=grid,
            in_specs=in_specs,
            out_specs=pl.BlockSpec((block_rows, width), lambda i: (i, 0)),
            compiler_params=compiler_params,
        )(lf, tf)
        if n_pad:
            out = out.reshape(-1)[:n_elems]
        return out.reshape(orig_shape)

    if reduction in ("mean", "sum"):
        partials = pl.pallas_call(
            functools.partial(
                _reduce_partial_kernel,
                threshold=threshold,
                valid_rows=rows,
                block_rows=block_rows,
            ),
            out_shape=jax.ShapeDtypeStruct((n_blocks * 8, width), jnp.float32),
            grid=grid,
            in_specs=in_specs,
            out_specs=pl.BlockSpec((8, width), lambda i: (i, 0)),
            compiler_params=compiler_params,
        )(lf, tf)
        total = jnp.sum(partials)          # tiny final reduce in plain JAX
        if reduction == "mean":
            total = total / jnp.float32(n_elems)
        return total.astype(out_dtype)

    raise NotImplementedError(reduction)


def _reference(logit, target, threshold=0.001, reduction="none"):
    abs_t = jnp.maximum(jnp.abs(target), 1e-8)
    sq = jnp.square(target - logit)
    loss = jnp.where(abs_t < threshold, sq, sq / abs_t)
    if reduction == "none":
        return loss
    if reduction == "mean":
        return jnp.mean(loss)
    return jnp.sum(loss)


if __name__ == "__main__":
    key = jax.random.PRNGKey(0)
    k1, k2 = jax.random.split(key)
    # NCHW-shaped example inputs (B=2, C=4, H=16, W=16)
    logit = jax.random.normal(k1, (2, 4, 16, 16), dtype=jnp.float32)
    target = jax.random.normal(k2, (2, 4, 16, 16), dtype=jnp.float32) * 0.01

    out_none = weighted_mse_loss(logit, target, reduction="none")
    out_mean = weighted_mse_loss(logit, target, reduction="mean")
    out_sum = weighted_mse_loss(logit, target, reduction="sum")
    jax.block_until_ready((out_none, out_mean, out_sum))

    assert out_none.shape == logit.shape and out_none.dtype == jnp.float32
    assert jnp.allclose(out_none, _reference(logit, target, reduction="none"),
                        rtol=1e-5, atol=1e-5)
    assert jnp.allclose(out_mean, _reference(logit, target, reduction="mean"),
                        rtol=1e-4, atol=1e-5)
    assert jnp.allclose(out_sum, _reference(logit, target, reduction="sum"),
                        rtol=1e-4, atol=1e-3)

    # Ragged shape: exercises pad-to-width + ragged-row-block masking paths.
    k3, k4 = jax.random.split(k2)
    logit2 = jax.random.normal(k3, (3, 5, 37, 29), dtype=jnp.float32)
    target2 = jax.random.normal(k4, (3, 5, 37, 29), dtype=jnp.float32) * 0.01
    out2_none = weighted_mse_loss(logit2, target2, reduction="none")
    out2_mean = weighted_mse_loss(logit2, target2, reduction="mean")
    jax.block_until_ready((out2_none, out2_mean))
    assert jnp.allclose(out2_none, _reference(logit2, target2, reduction="none"),
                        rtol=1e-5, atol=1e-5)
    assert jnp.allclose(out2_mean, _reference(logit2, target2, reduction="mean"),
                        rtol=1e-4, atol=1e-5)

    print("KERNEL_OK")
</pallas_src>

<mosaic_0001>
module attributes {stable_mosaic.version = 11 : i64} {
  func.func @_elementwise_kernel(%arg0: i32, %arg1: memref<8x256xf32, #tpu.memory_space<vmem>>, %arg2: memref<8x256xf32, #tpu.memory_space<vmem>>, %arg3: memref<8x256xf32, #tpu.memory_space<vmem>>) attributes {dimension_semantics = [#tpu.dimension_semantics<parallel>], iteration_bounds = array<i64: 1>, scalar_prefetch = 0 : i64, scratch_operands = 0 : i64, tpu.core_type = #tpu.core_type<tc>, window_params = [{transform_indices = @transform_0, window_bounds = array<i64: 8, 256>}, {transform_indices = @transform_1, window_bounds = array<i64: 8, 256>}, {transform_indices = @transform_2, window_bounds = array<i64: 8, 256>}]} {
    %c0 = arith.constant 0 : index
    %c0_0 = arith.constant 0 : index
    %0 = vector.load %arg1[%c0, %c0_0] : memref<8x256xf32, #tpu.memory_space<vmem>>, vector<8x256xf32>
    %c0_1 = arith.constant 0 : index
    %c0_2 = arith.constant 0 : index
    %1 = vector.load %arg2[%c0_1, %c0_2] : memref<8x256xf32, #tpu.memory_space<vmem>>, vector<8x256xf32>
    %2 = math.absf %1 : vector<8x256xf32>
    %cst = arith.constant 9.99999993E-9 : f32
    %3 = vector.broadcast %cst : f32 to vector<8x256xf32>
    %4 = arith.maximumf %2, %3 : vector<8x256xf32>
    %5 = arith.subf %1, %0 : vector<8x256xf32>
    %6 = arith.mulf %5, %5 : vector<8x256xf32>
    %cst_3 = arith.constant 1.000000e-03 : f32
    %7 = vector.broadcast %cst_3 : f32 to vector<8x256xf32>
    %8 = arith.cmpf olt, %4, %7 : vector<8x256xf32>
    %9 = arith.divf %6, %4 : vector<8x256xf32>
    %10 = arith.select %8, %6, %9 : vector<8x256xi1>, vector<8x256xf32>
    %c0_4 = arith.constant 0 : index
    %c0_5 = arith.constant 0 : index
    %11 = vector.load %arg3[%c0_4, %c0_5] : memref<8x256xf32, #tpu.memory_space<vmem>>, vector<8x256xf32>
    tpu.vector_store %arg3[%c0_4, %c0_5], %10 {strides = array<i32>} : memref<8x256xf32, #tpu.memory_space<vmem>>, vector<8x256xf32>,
    return
  }
  func.func @transform_0(%arg0: i32) -> (i32, i32) {
    %c0_i32 = arith.constant 0 : i32
    %c0_i32_0 = arith.constant 0 : i32
    return %arg0, %c0_i32 : i32, i32
  }
  func.func @transform_1(%arg0: i32) -> (i32, i32) {
    %c0_i32 = arith.constant 0 : i32
    %c0_i32_0 = arith.constant 0 : i32
    return %arg0, %c0_i32 : i32, i32
  }
  func.func @transform_2(%arg0: i32) -> (i32, i32) {
    %c0_i32 = arith.constant 0 : i32
    %c0_i32_0 = arith.constant 0 : i32
    return %arg0, %c0_i32 : i32, i32
  }
}

</mosaic_0001>

<bundles_post_ra>
// kernel: tpu_custom_call.1
= control target key start
LH: loop header
LB: loop body
LE: loop exit
PB: predicated region body
PF: predicated region fallthrough
CT: control target
= control target key end

     0   :  { %7 = vsyncpa [#allocation3], 0  ;;  %s174_s0 = inlined_call_operand.hbm [shape: f32[8,256], index: 0, kind: input, shape index: {}]   ;;  %s175_s1 = inlined_call_operand.hbm [shape: f32[8,256], index: 1, kind: input, shape index: {}]   ;;  %s176_s2 = inlined_call_operand.hbm [shape: f32[8,256], index: 2, kind: output, shape index: {}]  }
   0x1   :  { %8 = vsyncpa [#allocation6], 0 }
   0x2   :  { %9 = vsyncpa [#allocation4], 0  ;;  %s147_s9 = smov [#allocation2]   ;;  %s148_s11 = smov [#allocation5]  }
   0x3   :  { %s16_s10 = sshll.u32 %s147_s9, 4  ;;  %s26_s12 = sshll.u32 %s148_s11, 4  ;;  %s17_s10 = int_to_ptr.vmem [resolvable:$true] %s16_s10  ;;  %s27_s12 = int_to_ptr.vmem [resolvable:$true] %s26_s12 }
   0x4   :  { %s89_s13 = scalar_lea.vmem %s17_s10, 256  ;;  %p94_p1 = scmp.lt.s32.totalorder %s17_s10, %s17_s10 }
   0x5   :  { %p90_p0 = scmp.ne.s32.totalorder %s17_s10, %s89_s13  ;;  %p95_p2 = scmp.lt.s32.totalorder %s89_s13, %s89_s13 }
   0x7   :  { %p96_p3 = por %p95_p2, %p94_p1 }
   0x9   :  { %p97_p4 = pnand %p96_p3, %p90_p0 }
   0xb   :  { %100 = shalt.err (!%p97_p4)
}
   0xc   :  { %19 = dma.hbm_to_vmem [thread:$0]  %s174_s0, 256, %s17_s10, [#allocation3]  }
   0xd   :  { %s109_s16 = scalar_lea.vmem %s27_s12, 256  ;;  %p114_p6 = scmp.lt.s32.totalorder %s27_s12, %s27_s12 }
   0xe   :  { %p110_p5 = scmp.ne.s32.totalorder %s27_s12, %s109_s16  ;;  %p115_p7 = scmp.lt.s32.totalorder %s109_s16, %s109_s16 }
  0x10   :  { %p116_p8 = por %p115_p7, %p114_p6 }
  0x12   :  { %p117_p9 = pnand %p116_p8, %p110_p5 }
  0x14   :  { %120 = shalt.err (!%p117_p9)
}
  0x15   :  { %29 = dma.hbm_to_vmem [thread:$0]  %s175_s1, 256, %s27_s12, [#allocation6]  }
  0x16   :  { %141 = dma.done.wait [#allocation3], 256  }
  0x17   :  { %142 = vsyncadd [#allocation3], 4294967040 }
  0x18   :  { %143 = dma.done.wait [#allocation6], 256  }
  0x19   :  { %144 = vsyncadd [#allocation6], 4294967040  ;;  %v38_v0 = vld [vmem:[#allocation5] sm:$0xff]  ;;  %v39_v2 = vld [vmem:[#allocation5 + $0x8] sm:$0xff]  ;;  %s149_s0 = smov [#allocation7]  }
  0x1a   :  { %v40_v1 = vand.u32 2147483647, %v38_v0  ;;  %v41_v3 = vand.u32 2147483647, %v39_v2  ;;  %v36_v6 = vld [vmem:[#allocation2] sm:$0xff]  ;;  %v37_v7 = vld [vmem:[#allocation2 + $0x8] sm:$0xff] }
  0x1b   :  { %v44_v8 = vsub.f32 %v38_v0, %v36_v6  ;;  %v45_v9 = vsub.f32 %v39_v2, %v37_v7  ;;  %s64_s1 = sshll.u32 %s149_s0, 4  ;;  %s65_s1 = int_to_ptr.vmem [resolvable:$true] %s64_s1 }
  0x1c   :  { %v42_v4 = vmax.f32 %v40_v1, 1e-08  ;;  %v43_v5 = vmax.f32 %v41_v3, 1e-08  ;;  %s121_s19 = scalar_lea.vmem %s65_s1, 256  ;;  %p126_p11 = scmp.lt.s32.totalorder %s65_s1, %s65_s1 }
  0x1d   :  { %v46_v10 = vmul.f32 %v44_v8, %v44_v8  ;;  %v47_v11 = vmul.f32 %v45_v9, %v45_v9  ;;  %p122_p10 = scmp.ne.s32.totalorder %s65_s1, %s121_s19  ;;  %p127_p12 = scmp.lt.s32.totalorder %s121_s19, %s121_s19 }
  0x1e   :  { %77 = vrcp.f32 %v42_v4  ;;  %vm48_vm0 = vcmp.lt.f32.partialorder %v42_v4, 0.001  ;;  %vm49_vm1 = vcmp.lt.f32.partialorder %v43_v5, 0.001 }
  0x1f   :  { %79 = vrcp.f32 %v43_v5  ;;  %p128_p13 = por %p127_p12, %p126_p11 }
  0x21   :  { %p129_p0 = pnand %p128_p13, %p122_p10 }
  0x2b   :  { %v78_v12 = vpop.eup %77 }
  0x2c   :  { %v80_v13 = vpop.eup %79  ;;  %v51_v14 = vmul.f32 %v78_v12, %v46_v10 }
  0x2d   :  { %v53_v15 = vmul.f32 %v80_v13, %v47_v11 }
  0x2e   :  { %v54_v16 = vsel %vm48_vm0, %v46_v10, %v51_v14 }
  0x2f   :  { %56 = vst [vmem:[#allocation7] sm:$0xff] %v54_v16  ;;  %v55_v17 = vsel %vm49_vm1, %v47_v11, %v53_v15 }
  0x30   :  { %57 = vst [vmem:[#allocation7 + $0x8] sm:$0xff] %v55_v17 }
  0x31   :  { %132 = shalt.err (!%p129_p0)
}
  0x32   :  { %67 = dma.vmem_to_hbm [thread:$0]  %s65_s1, 256, %s176_s2, [#allocation4]  }
  0x33   :  { %145 = dma.done.wait [#allocation4], 256  }
  0x34   :  { %146 = vsyncadd [#allocation4], 4294967040 }
  0x35   :  { %71 = vsyncpa [#allocation3], 1 }
  0x36   :  { %72 = vsyncpa [#allocation6], 1 }
  0x37   :  { %73 = vsyncpa [#allocation4], 1 }

</bundles_post_ra>
